<compile_context>
chip_gen: v6e
topology: v6e:2x2x1
jax: 0.10.0
libtpu: 0.0.40
codegen_flags: <defaults>
</compile_context>

<pallas_src>
import jax
import jax.numpy as jnp
from jax.experimental import pallas as pl
from jax.experimental.pallas import tpu as pltpu


def _round_up(x, m):
    return ((x + m - 1) // m) * m


def crps_kernel(x_ref, y_ref, out_ref):
    """One batch tile (tb, N) -> scalar partial, replicated over an (8,128) tile."""
    # In-kernel cast: bf16/f16 inputs feed straight from HBM, cast is a free VPU op.
    d = x_ref[...].astype(jnp.float32) - y_ref[...].astype(jnp.float32)   # (tb, N)
    n = d.shape[-1]

    # Upper-triangular ones (tri[k, j] = 1 iff k <= j), generated on-chip —
    # no N*N HBM input / DMA stream for it.
    rows = jax.lax.broadcasted_iota(jnp.int32, (n, n), 0)
    cols = jax.lax.broadcasted_iota(jnp.int32, (n, n), 1)
    tri = (rows <= cols).astype(jnp.float32)                              # (N, N)

    # cumsum along bins on the MXU; HIGHEST precision = exact-f32 contraction.
    c = jnp.dot(d, tri,
                preferred_element_type=jnp.float32,
                precision=jax.lax.Precision.HIGHEST)                      # (tb, N)

    per_row = jnp.mean(c * c, axis=1, keepdims=True)                      # (tb, 1)
    partial = jnp.sum(per_row, axis=0, keepdims=True)                     # (1, 1)

    # Lane-dense, tile-aligned (8, 128) store of this block's partial sum
    # (unmasked vst; each grid step owns a distinct output tile -> "parallel").
    out_ref[...] = jnp.broadcast_to(partial, out_ref.shape)


def crps(x, y, *, tb=None):
    """CRPS loss matching the PyTorch module's forward pass."""
    assert x.shape == y.shape and x.ndim == 2 and x.dtype == y.dtype
    B, N = x.shape
    itemsize = jnp.dtype(x.dtype).itemsize
    # Sublane granularity for the input dtype: 8 (f32), 16 (bf16), 32 (int8).
    sub = max(8, 32 // itemsize)

    if tb is None:
        # >=256 LHS rows per matmul fills the 2x256x256 MXU on v6e/v7x; for
        # small B just round the whole batch up to one tile.
        tb = 256 if B >= 256 else _round_up(B, sub)
    assert tb % sub == 0, (tb, sub)

    B_pad = _round_up(B, tb)
    num_blocks = B_pad // tb
    if B_pad != B:
        # Zero-padded rows have x == y == 0, hence contribute 0 loss.
        x = jnp.pad(x, ((0, B_pad - B), (0, 0)))
        y = jnp.pad(y, ((0, B_pad - B), (0, 0)))

    cost = pl.CostEstimate(
        flops=2 * B_pad * N * N + 4 * B_pad * N,
        transcendentals=0,
        bytes_accessed=2 * B_pad * N * itemsize + num_blocks * 8 * 128 * 4,
    )

    out = pl.pallas_call(
        crps_kernel,
        out_shape=jax.ShapeDtypeStruct((num_blocks * 8, 128), jnp.float32),
        grid=(num_blocks,),
        in_specs=[
            pl.BlockSpec((tb, N), lambda i: (i, 0)),
            pl.BlockSpec((tb, N), lambda i: (i, 0)),
        ],
        out_specs=pl.BlockSpec((8, 128), lambda i: (i, 0)),
        compiler_params=pltpu.CompilerParams(
            dimension_semantics=("parallel",),
        ),
        cost_estimate=cost,
    )(x, y)

    # Tiny finalization: one scalar per block -> total loss.
    partials = out.reshape(num_blocks, 8, 128)[:, 0, 0]
    return jnp.sum(partials)


def crps_ref(x, y):
    # Pure-JAX reference, mirrors the PyTorch forward exactly (in f32).
    x = x.astype(jnp.float32)
    y = y.astype(jnp.float32)
    diff = jnp.cumsum(x, axis=1) - jnp.cumsum(y, axis=1)
    return jnp.sum(jnp.mean(diff * diff, axis=1))


if __name__ == "__main__":
    key = jax.random.PRNGKey(0)
    k1, k2, k3, k4, k5, k6 = jax.random.split(key, 6)
    N = 128

    # 1) Small f32 batch (single block) — matches the PyTorch module's usage.
    B = 8
    x = jax.random.normal(k1, (B, N), dtype=jnp.float32)
    y = jax.random.normal(k2, (B, N), dtype=jnp.float32)
    out = jax.block_until_ready(crps(x, y))
    ref = crps_ref(x, y)
    assert jnp.allclose(out, ref, rtol=1e-5, atol=1e-5), (out, ref)

    # 2) Non-multiple batch with explicit tiling: multi-block grid + zero padding.
    B2 = 20
    x2 = jax.random.normal(k3, (B2, N), dtype=jnp.float32)
    y2 = jax.random.normal(k4, (B2, N), dtype=jnp.float32)
    out2 = jax.block_until_ready(crps(x2, y2, tb=8))
    ref2 = crps_ref(x2, y2)
    assert jnp.allclose(out2, ref2, rtol=1e-5, atol=1e-5), (out2, ref2)

    # 3) bf16 inputs — cast happens in-kernel, no wrapper-side f32 HBM copies.
    B3 = 16
    x3 = jax.random.normal(k5, (B3, N), dtype=jnp.bfloat16)
    y3 = jax.random.normal(k6, (B3, N), dtype=jnp.bfloat16)
    out3 = jax.block_until_ready(crps(x3, y3))
    ref3 = crps_ref(x3, y3)
    assert jnp.allclose(out3, ref3, rtol=1e-4, atol=1e-4), (out3, ref3)

    print("KERNEL_OK")
</pallas_src>

<mosaic_0001>
module attributes {stable_mosaic.version = 11 : i64} {
  func.func @crps_kernel(%arg0: i32, %arg1: memref<8x128xf32, #tpu.memory_space<vmem>>, %arg2: memref<8x128xf32, #tpu.memory_space<vmem>>, %arg3: memref<8x128xf32, #tpu.memory_space<vmem>>) attributes {dimension_semantics = [#tpu.dimension_semantics<parallel>], iteration_bounds = array<i64: 1>, scalar_prefetch = 0 : i64, scratch_operands = 0 : i64, tpu.core_type = #tpu.core_type<tc>, window_params = [{transform_indices = @transform_0, window_bounds = array<i64: 8, 128>}, {transform_indices = @transform_1, window_bounds = array<i64: 8, 128>}, {transform_indices = @transform_2, window_bounds = array<i64: 8, 128>}]} {
    %c0 = arith.constant 0 : index
    %c0_0 = arith.constant 0 : index
    %0 = vector.load %arg1[%c0, %c0_0] : memref<8x128xf32, #tpu.memory_space<vmem>>, vector<8x128xf32>
    %c0_1 = arith.constant 0 : index
    %c0_2 = arith.constant 0 : index
    %1 = vector.load %arg2[%c0_1, %c0_2] : memref<8x128xf32, #tpu.memory_space<vmem>>, vector<8x128xf32>
    %2 = arith.subf %0, %1 : vector<8x128xf32>
    %3 = tpu.iota {dimensions = array<i32: 0>} : vector<128x128xi32>
    %4 = tpu.iota {dimensions = array<i32: 1>} : vector<128x128xi32>
    %5 = arith.cmpi sle, %3, %4 : vector<128x128xi32>
    %6 = arith.extui %5 : vector<128x128xi1> to vector<128x128xi32>
    %7 = arith.sitofp %6 : vector<128x128xi32> to vector<128x128xf32>
    %cst = arith.constant dense<0.000000e+00> : vector<8x128xf32>
    %8 = tpu.matmul %2, %7, %cst {dimension_numbers = #tpu.dot_dimension_numbers<[1], [0], [0], [1], [0, 0, 1, 1], [], []>, precision = #tpu.contract_precision<fp32>} : vector<8x128xf32>, vector<128x128xf32>, vector<8x128xf32> -> vector<8x128xf32>
    %9 = arith.mulf %8, %8 : vector<8x128xf32>
    %cst_3 = arith.constant dense<0.000000e+00> : vector<8xf32>
    %10 = vector.multi_reduction <add>, %9, %cst_3 [1] : vector<8x128xf32> to vector<8xf32>
    %11 = vector.shape_cast %10 : vector<8xf32> to vector<8x1xf32>
    %cst_4 = arith.constant 1.280000e+02 : f32
    %12 = vector.broadcast %cst_4 : f32 to vector<8x1xf32>
    %13 = arith.divf %11, %12 : vector<8x1xf32>
    %cst_5 = arith.constant dense<0.000000e+00> : vector<1xf32>
    %14 = vector.multi_reduction <add>, %13, %cst_5 [0] : vector<8x1xf32> to vector<1xf32>
    %15 = vector.shape_cast %14 : vector<1xf32> to vector<1x1xf32>
    %16 = vector.shape_cast %15 : vector<1x1xf32> to vector<1x1xf32>
    %17 = vector.broadcast %16 : vector<1x1xf32> to vector<8x128xf32>
    %c0_6 = arith.constant 0 : index
    %c0_7 = arith.constant 0 : index
    %18 = vector.load %arg3[%c0_6, %c0_7] : memref<8x128xf32, #tpu.memory_space<vmem>>, vector<8x128xf32>
    tpu.vector_store %arg3[%c0_6, %c0_7], %17 {strides = array<i32>} : memref<8x128xf32, #tpu.memory_space<vmem>>, vector<8x128xf32>,
    return
  }
  func.func @transform_0(%arg0: i32) -> (i32, i32) {
    %c0_i32 = arith.constant 0 : i32
    %c0_i32_0 = arith.constant 0 : i32
    return %arg0, %c0_i32 : i32, i32
  }
  func.func @transform_1(%arg0: i32) -> (i32, i32) {
    %c0_i32 = arith.constant 0 : i32
    %c0_i32_0 = arith.constant 0 : i32
    return %arg0, %c0_i32 : i32, i32
  }
  func.func @transform_2(%arg0: i32) -> (i32, i32) {
    %c0_i32 = arith.constant 0 : i32
    %c0_i32_0 = arith.constant 0 : i32
    return %arg0, %c0_i32 : i32, i32
  }
}

</mosaic_0001>

<bundles_post_ra>
// kernel: tpu_custom_call.1
= control target key start
LH: loop header
LB: loop body
LE: loop exit
PB: predicated region body
PF: predicated region fallthrough
CT: control target
= control target key end

     0   :  { %7 = vsyncpa [#allocation3], 0  ;;  %s1857_s0 = inlined_call_operand.hbm [shape: f32[8,128], index: 0, kind: input, shape index: {}]   ;;  %s1858_s1 = inlined_call_operand.hbm [shape: f32[8,128], index: 1, kind: input, shape index: {}]   ;;  %s1859_s2 = inlined_call_operand.hbm [shape: f32[8,128], index: 2, kind: output, shape index: {}]  }
   0x1   :  { %8 = vsyncpa [#allocation6], 0 }
   0x2   :  { %9 = vsyncpa [#allocation4], 0  ;;  %s1223_s9 = smov [#allocation2]   ;;  %s1224_s11 = smov [#allocation5]  }
   0x3   :  { %s16_s10 = sshll.u32 %s1223_s9, 4  ;;  %s26_s12 = sshll.u32 %s1224_s11, 4  ;;  %s17_s10 = int_to_ptr.vmem [resolvable:$true] %s16_s10  ;;  %s27_s12 = int_to_ptr.vmem [resolvable:$true] %s26_s12 }
   0x4   :  { %s1165_s13 = scalar_lea.vmem %s17_s10, 128  ;;  %p1170_p1 = scmp.lt.s32.totalorder %s17_s10, %s17_s10 }
   0x5   :  { %p1166_p0 = scmp.ne.s32.totalorder %s17_s10, %s1165_s13  ;;  %p1171_p2 = scmp.lt.s32.totalorder %s1165_s13, %s1165_s13 }
   0x7   :  { %p1172_p3 = por %p1171_p2, %p1170_p1 }
   0x9   :  { %p1173_p4 = pnand %p1172_p3, %p1166_p0 }
   0xb   :  { %1176 = shalt.err (!%p1173_p4)
}
   0xc   :  { %19 = dma.hbm_to_vmem [thread:$0]  %s1857_s0, 128, %s17_s10, [#allocation3]  }
   0xd   :  { %s1185_s16 = scalar_lea.vmem %s27_s12, 128  ;;  %p1190_p6 = scmp.lt.s32.totalorder %s27_s12, %s27_s12 }
   0xe   :  { %p1186_p5 = scmp.ne.s32.totalorder %s27_s12, %s1185_s16  ;;  %p1191_p7 = scmp.lt.s32.totalorder %s1185_s16, %s1185_s16 }
  0x10   :  { %p1192_p8 = por %p1191_p7, %p1190_p6 }
  0x12   :  { %p1193_p9 = pnand %p1192_p8, %p1186_p5 }
  0x14   :  { %1196 = shalt.err (!%p1193_p9)
}
  0x15   :  { %29 = dma.hbm_to_vmem [thread:$0]  %s1858_s1, 128, %s27_s12, [#allocation6]  }
  0x16   :  { %1217 = dma.done.wait [#allocation3], 128  }
  0x17   :  { %1218 = vsyncadd [#allocation3], 4294967168  ;;  %v39_v0 = vlaneseq }
  0x18   :  { %1219 = dma.done.wait [#allocation6], 128  }
  0x19   :  { %1220 = vsyncadd [#allocation6], 4294967168  ;;  %v1225_v1 = vmov 0.0   ;;  %v1252_v2 = vshrl.u32 %v39_v0, 7  ;;  %v1254_v3 = vand.u32 127, %v39_v0  ;;  %vm1860_vm0 = vmmov 0  }
  0x1a   :  { %941 = vmatprep.subr.mxu0 %v1225_v1  ;;  %976 = vmatprep.subr.mxu1 %v1225_v1  ;;  %v1227_v12 = vmov 1.0   ;;  %s1228_s0 = smov [#allocation7]  }
  0x1b   :  { %973 = vmatprep.mubr.msk.f32.mxu0 %vm1860_vm0, %v1225_v1  ;;  %1008 = vmatprep.mubr.msk.f32.mxu1 %vm1860_vm0, %v1225_v1  ;;  %v1261_v4 = vadd.s32 120, %v1252_v2  ;;  %v1264_v5 = vadd.s32 112, %v1252_v2  ;;  %v1267_v6 = vadd.s32 104, %v1252_v2  ;;  %v1270_v7 = vadd.s32 96, %v1252_v2  ;;  %s765_s1 = sshll.u32 %s1228_s0, 4  ;;  %s766_s1 = int_to_ptr.vmem [resolvable:$true] %s765_s1 }
  0x1c   :  { %v1273_v8 = vadd.s32 88, %v1252_v2  ;;  %v1276_v9 = vadd.s32 80, %v1252_v2  ;;  %v1279_v10 = vadd.s32 72, %v1252_v2  ;;  %v1282_v11 = vadd.s32 64, %v1252_v2  ;;  %s1197_s19 = scalar_lea.vmem %s766_s1, 128  ;;  %p1202_p11 = scmp.lt.s32.totalorder %s766_s1, %s766_s1 }
  0x1d   :  { %vm73_vm1 = vcmp.le.s32.totalorder %v1261_v4, %v1254_v3  ;;  %vm72_vm2 = vcmp.le.s32.totalorder %v1264_v5, %v1254_v3  ;;  %vm71_vm3 = vcmp.le.s32.totalorder %v1267_v6, %v1254_v3  ;;  %vm70_vm4 = vcmp.le.s32.totalorder %v1270_v7, %v1254_v3  ;;  %p1198_p10 = scmp.ne.s32.totalorder %s766_s1, %s1197_s19  ;;  %p1203_p12 = scmp.lt.s32.totalorder %s1197_s19, %s1197_s19 }
  0x1e   :  { %942 = vmatpush3.msk.msra.mxu0 %vm73_vm1, %v1227_v12  ;;  %v789_v13 = vsel %vm72_vm2, 1.0, %v1225_v1  ;;  %v788_v14 = vsel %vm71_vm3, 1.0, %v1225_v1  ;;  %v787_v15 = vsel %vm70_vm4, 1.0, %v1225_v1  ;;  %vm69_vm5 = vcmp.le.s32.totalorder %v1273_v8, %v1254_v3 }
  0x1f   :  { %943 = vmatprep.subr.mxu0 %v1225_v1  ;;  %v1311_v16 = vsub.f32 %v789_v13, %v789_v13  ;;  %v1313_v17 = vsub.f32 %v788_v14, %v788_v14  ;;  %v1315_v18 = vsub.f32 %v787_v15, %v787_v15  ;;  %v786_v19 = vsel %vm69_vm5, 1.0, %v1225_v1  ;;  %p1204_p13 = por %p1203_p12, %p1202_p11 }
  0x20   :  { %944 = vmatpush3.msk.msra.mxu0 %vm72_vm2, %v1227_v12  ;;  %v1325_v20 = vsub.f32 %v786_v19, %v786_v19  ;;  %v790_v21 = vsel %vm73_vm1, 1.0, %v1225_v1  ;;  %vm68_vm6 = vcmp.le.s32.totalorder %v1276_v9, %v1254_v3  ;;  %vm67_vm7 = vcmp.le.s32.totalorder %v1279_v10, %v1254_v3 }
  0x21   :  { %945 = vmatprep.subr.mxu0 %v1225_v1  ;;  %v1336_v22 = vsub.f32 %v790_v21, %v790_v21  ;;  %v785_v23 = vsel %vm68_vm6, 1.0, %v1225_v1  ;;  %v207_v24 = vand.u32 4294901760, %v1311_v16  ;;  %v784_v26 = vsel %vm67_vm7, 1.0, %v1225_v1  ;;  %v36_v21 = vld [vmem:[#allocation2] sm:$0xff]  ;;  %p1205_p0 = pnand %p1204_p13, %p1198_p10 }
  0x22   :  { %946 = vmatpush3.msk.msra.mxu0 %vm71_vm3, %v1227_v12  ;;  %v1347_v25 = vsub.f32 %v785_v23, %v785_v23  ;;  %v214_v27 = vand.u32 4294901760, %v1313_v17  ;;  %vm66_vm8 = vcmp.le.s32.totalorder %v1282_v11, %v1254_v3  ;;  %v221_v31 = vand.u32 4294901760, %v1315_v18  ;;  %v37_v23 = vld [vmem:[#allocation5] sm:$0xff] }
  0x23   :  { %947 = vmatprep.subr.mxu0 %v1225_v1  ;;  %v200_v28 = vand.u32 4294901760, %v1336_v22  ;;  %v208_v29 = vsub.f32 %v1311_v16, %v207_v24  ;;  %v783_v30 = vsel %vm66_vm8, 1.0, %v1225_v1  ;;  %v1374_v33 = vadd.s32 56, %v1252_v2 }
  0x24   :  { %948 = vmatpush3.msk.msra.mxu0 %vm70_vm4, %v1227_v12  ;;  %v215_v32 = vsub.f32 %v1313_v17, %v214_v27  ;;  %v228_v34 = vand.u32 4294901760, %v1325_v20  ;;  %v1381_v36 = vsub.f32 %v784_v26, %v784_v26  ;;  %v1384_v37 = vadd.s32 48, %v1252_v2 }
  0x25   :  { %949 = vmatprep.subr.mxu0 %v1225_v1  ;;  %v201_v35 = vsub.f32 %v1336_v22, %v200_v28  ;;  %v1390_v38 = vsub.f32 %v783_v30, %v783_v30  ;;  %v222_v39 = vsub.f32 %v1315_v18, %v221_v31  ;;  %vm1862_vm9 = vcmp.le.s32.totalorder %v1374_v33, %v1254_v3 }
  0x26   :  { %950 = vmatpush3.msk.msra.mxu0 %vm69_vm5, %v1227_v12  ;;  %v235_v40 = vand.u32 4294901760, %v1347_v25  ;;  %v209_v42 = vand.u32 4294901760, %v208_v29  ;;  %v782_v43 = vsel %vm1862_vm9, 1.0, %v1225_v1  ;;  %vm64_vm10 = vcmp.le.s32.totalorder %v1384_v37, %v1254_v3 }
  0x27   :  { %951 = vmatprep.subr.mxu0 %v1225_v1  ;;  %v202_v41 = vand.u32 4294901760, %v201_v35  ;;  %v216_v44 = vand.u32 4294901760, %v215_v32  ;;  %v229_v45 = vsub.f32 %v1325_v20, %v228_v34  ;;  %v781_v46 = vsel %vm64_vm10, 1.0, %v1225_v1 }
  0x28   :  { %952 = vmatpush3.msk.msra.mxu0 %vm68_vm6, %v1227_v12  ;;  %v1417_v47 = vsub.f32 %v782_v43, %v782_v43  ;;  %v1420_v48 = vadd.s32 40, %v1252_v2  ;;  %v242_v49 = vand.u32 4294901760, %v1381_v36  ;;  %v1424_v50 = vadd.s32 32, %v1252_v2 }
  0x29   :  { %977 = vmatpush3.msra.mxu1 %v202_v41  ;;  %953 = vmatprep.subr.mxu0 %v1225_v1  ;;  %v223_v51 = vand.u32 4294901760, %v222_v39  ;;  %v1431_v52 = vsub.f32 %v781_v46, %v781_v46  ;;  %v236_v53 = vsub.f32 %v1347_v25, %v235_v40  ;;  %v1437_v54 = vadd.s32 24, %v1252_v2 }
  0x2a   :  { %978 = vmatprep.subr.mxu1 %v1225_v1  ;;  %954 = vmatpush3.msk.msra.mxu0 %vm67_vm7, %v1227_v12  ;;  %vm63_vm11 = vcmp.le.s32.totalorder %v1420_v48, %v1254_v3  ;;  %vm62_vm12 = vcmp.le.s32.totalorder %v1424_v50, %v1254_v3  ;;  %v249_v55 = vand.u32 4294901760, %v1390_v38  ;;  %v1446_v56 = vadd.s32 16, %v1252_v2 }
  0x2b   :  { %979 = vmatpush3.msra.mxu1 %v209_v42  ;;  %955 = vmatprep.subr.mxu0 %v1225_v1  ;;  %v780_v57 = vsel %vm63_vm11, 1.0, %v1225_v1  ;;  %v243_v58 = vsub.f32 %v1381_v36, %v242_v49  ;;  %v779_v59 = vsel %vm62_vm12, 1.0, %v1225_v1  ;;  %vm61_vm13 = vcmp.le.s32.totalorder %v1437_v54, %v1254_v3 }
  0x2c   :  { %980 = vmatprep.subr.mxu1 %v1225_v1  ;;  %956 = vmatpush3.msk.msra.mxu0 %vm66_vm8, %v1227_v12  ;;  %v230_v60 = vand.u32 4294901760, %v229_v45  ;;  %v1467_v61 = vsub.f32 %v780_v57, %v780_v57  ;;  %v778_v62 = vsel %vm61_vm13, 1.0, %v1225_v1  ;;  %v256_v63 = vand.u32 4294901760, %v1417_v47 }
  0x2d   :  { %981 = vmatpush3.msra.mxu1 %v216_v44  ;;  %957 = vmatprep.subr.mxu0 %v1225_v1  ;;  %v237_v0 = vand.u32 4294901760, %v236_v53  ;;  %vm60_vm14 = vcmp.le.s32.totalorder %v1446_v56, %v1254_v3  ;;  %v1482_v13 = vsub.f32 %v779_v59, %v779_v59  ;;  %v250_v14 = vsub.f32 %v1390_v38, %v249_v55 }
  0x2e   :  { %982 = vmatprep.subr.mxu1 %v1225_v1  ;;  %958 = vmatpush3.msk.msra.mxu0 %vm1862_vm9, %v1227_v12  ;;  %v263_v15 = vand.u32 4294901760, %v1431_v52  ;;  %v1489_v19 = vadd.s32 8, %v1252_v2  ;;  %v244_v26 = vand.u32 4294901760, %v243_v58  ;;  %v1496_v29 = vsub.f32 %v778_v62, %v778_v62 }
  0x2f   :  { %983 = vmatpush3.msra.mxu1 %v223_v51  ;;  %959 = vmatprep.subr.mxu0 %v1225_v1  ;;  %v777_v30 = vsel %vm60_vm14, 1.0, %v1225_v1  ;;  %v257_v32 = vsub.f32 %v1417_v47, %v256_v63  ;;  %v270_v35 = vand.u32 4294901760, %v1467_v61  ;;  %vm58_vm0 = vcmp.le.s32.totalorder %v1252_v2, %v1254_v3 }
  0x30   :  { %984 = vmatprep.subr.mxu1 %v1225_v1  ;;  %960 = vmatpush3.msk.msra.mxu0 %vm64_vm10, %v1227_v12  ;;  %vm59_vm15 = vcmp.le.s32.totalorder %v1489_v19, %v1254_v3  ;;  %v38_v41 = vsub.f32 %v36_v21, %v37_v23  ;;  %v251_v42 = vand.u32 4294901760, %v250_v14  ;;  %v1521_v43 = vsub.f32 %v777_v30, %v777_v30 }
  0x31   :  { %985 = vmatpush3.msra.mxu1 %v230_v60  ;;  %961 = vmatprep.subr.mxu0 %v1225_v1  ;;  %v776_v39 = vsel %vm59_vm15, 1.0, %v1225_v1  ;;  %v264_v44 = vsub.f32 %v1431_v52, %v263_v15  ;;  %v277_v45 = vand.u32 4294901760, %v1482_v13  ;;  %v775_v46 = vsel %vm58_vm0, 1.0, %v1225_v1 }
  0x32   :  { %986 = vmatprep.subr.mxu1 %v1225_v1  ;;  %962 = vmatpush3.msk.msra.mxu0 %vm63_vm11, %v1227_v12  ;;  %v1536_v51 = vand.u32 4294901760, %v38_v41  ;;  %v258_v53 = vand.u32 4294901760, %v257_v32  ;;  %v1539_v57 = vsub.f32 %v776_v39, %v776_v39  ;;  %v271_v58 = vsub.f32 %v1467_v61, %v270_v35 }
  0x33   :  { %987 = vmatpush3.msra.mxu1 %v237_v0  ;;  %963 = vmatprep.subr.mxu0 %v1225_v1  ;;  %v284_v59 = vand.u32 4294901760, %v1496_v29  ;;  %v265_v62 = vand.u32 4294901760, %v264_v44  ;;  %v1554_v0 = vsub.f32 %v775_v46, %v775_v46  ;;  %v278_v14 = vsub.f32 %v1482_v13, %v277_v45 }
  0x34   :  { %988 = vmatprep.subr.mxu1 %v1225_v1  ;;  %964 = vmatpush3.msk.msra.mxu0 %vm62_vm12, %v1227_v12  ;;  %v1551_v60 = vsub.f32 %v38_v41, %v1536_v51  ;;  %v291_v21 = vand.u32 4294901760, %v1521_v43  ;;  %v298_v32 = vand.u32 4294901760, %v1539_v57 }
  0x35   :  { %989 = vmatpush3.msra.mxu1 %v244_v26  ;;  %965 = vmatprep.subr.mxu0 %v1225_v1  ;;  %v272_v26 = vand.u32 4294901760, %v271_v58  ;;  %v285_v30 = vsub.f32 %v1496_v29, %v284_v59  ;;  %v279_v41 = vand.u32 4294901760, %v278_v14  ;;  %v305_v44 = vand.u32 4294901760, %v1554_v0 }
  0x36   :  { %990 = vmatprep.subr.mxu1 %v1225_v1  ;;  %966 = vmatpush3.msk.msra.mxu0 %vm61_vm13, %v1227_v12  ;;  %v189_v23 = vand.u32 4294901760, %v1551_v60  ;;  %v299_v58 = vsub.f32 %v1539_v57, %v298_v32 }
  0x37   :  { %991 = vmatpush3.msra.mxu1 %v251_v42  ;;  %967 = vmatprep.subr.mxu0 %v1225_v1  ;;  %v292_v42 = vsub.f32 %v1521_v43, %v291_v21  ;;  %v306_v14 = vsub.f32 %v1554_v0, %v305_v44 }
  0x38   :  { %992 = vmatprep.subr.mxu1 %v1225_v1  ;;  %968 = vmatpush3.msk.msra.mxu0 %vm60_vm14, %v1227_v12  ;;  %v190_v39 = vsub.f32 %v1551_v60, %v189_v23 }
  0x39   :  { %993 = vmatpush3.msra.mxu1 %v258_v53  ;;  %969 = vmatprep.subr.mxu0 %v1225_v1  ;;  %v286_v53 = vand.u32 4294901760, %v285_v30  ;;  %v307_v30 = vand.u32 4294901760, %v306_v14 }
  0x3a   :  { %994 = vmatprep.subr.mxu1 %v1225_v1  ;;  %970 = vmatpush3.msk.msra.mxu0 %vm59_vm15, %v1227_v12  ;;  %v191_v46 = vand.u32 4294901760, %v190_v39 }
  0x3b   :  { %995 = vmatpush3.msra.mxu1 %v265_v62  ;;  %971 = vmatprep.subr.mxu0 %v1225_v1  ;;  %v293_v62 = vand.u32 4294901760, %v292_v42 }
  0x3c   :  { %996 = vmatprep.subr.mxu1 %v1225_v1  ;;  %972 = vmatpush3.msk.msra.mxu0 %vm58_vm0, %v1227_v12 }
  0x3d   :  { %997 = vmatpush3.msra.mxu1 %v272_v26  ;;  %1011 = vmatprep.subr.mxu0 %v1225_v1  ;;  %v300_v26 = vand.u32 4294901760, %v299_v58 }
  0x3e   :  { %998 = vmatprep.subr.mxu1 %v1225_v1  ;;  %974 = vmatmul.mubr.f32.vlgmr.msra.gmra.mxu0 %v191_v46 }
  0x3f   :  { %999 = vmatpush3.msra.mxu1 %v279_v41  ;;  %1012 = vmatpush3.msra.mxu0 %v1336_v22 }
  0x40   :  { %1000 = vmatprep.subr.mxu1 %v1225_v1  ;;  %1013 = vmatprep.subr.mxu0 %v1225_v1 }
  0x41   :  { %1001 = vmatpush3.msra.mxu1 %v286_v53  ;;  %1014 = vmatpush3.msra.mxu0 %v1311_v16 }
  0x42   :  { %1002 = vmatprep.subr.mxu1 %v1225_v1  ;;  %1015 = vmatprep.subr.mxu0 %v1225_v1 }
  0x43   :  { %1003 = vmatpush3.msra.mxu1 %v293_v62  ;;  %1016 = vmatpush3.msra.mxu0 %v1313_v17 }
  0x44   :  { %1004 = vmatprep.subr.mxu1 %v1225_v1  ;;  %1017 = vmatprep.subr.mxu0 %v1225_v1 }
  0x45   :  { %1005 = vmatpush3.msra.mxu1 %v300_v26  ;;  %1018 = vmatpush3.msra.mxu0 %v1315_v18 }
  0x46   :  { %1006 = vmatprep.subr.mxu1 %v1225_v1  ;;  %1019 = vmatprep.subr.mxu0 %v1225_v1 }
  0x47   :  { %1007 = vmatpush3.msra.mxu1 %v307_v30  ;;  %1020 = vmatpush3.msra.mxu0 %v1325_v20 }
  0x48   :  { %1009 = vmatmul.mubr.f32.vlgmr.msra.gmra.mxu1 %v1536_v51  ;;  %1046 = vmatprep.subr.mxu1 %v1225_v1 }
  0x49   :  { %1021 = vmatprep.subr.mxu0 %v1225_v1  ;;  %1047 = vmatpush3.msk.msra.mxu1 %vm73_vm1, %v1227_v12 }
  0x4a   :  { %1022 = vmatpush3.msra.mxu0 %v1347_v25  ;;  %1048 = vmatprep.subr.mxu1 %v1225_v1 }
  0x4b   :  { %1023 = vmatprep.subr.mxu0 %v1225_v1  ;;  %1049 = vmatpush3.msk.msra.mxu1 %vm72_vm2, %v1227_v12 }
  0x4c   :  { %1024 = vmatpush3.msra.mxu0 %v1381_v36  ;;  %1050 = vmatprep.subr.mxu1 %v1225_v1 }
  0x4d   :  { %1025 = vmatprep.subr.mxu0 %v1225_v1  ;;  %1051 = vmatpush3.msk.msra.mxu1 %vm71_vm3, %v1227_v12 }
  0x4e   :  { %1026 = vmatpush3.msra.mxu0 %v1390_v38  ;;  %1052 = vmatprep.subr.mxu1 %v1225_v1 }
  0x4f   :  { %1027 = vmatprep.subr.mxu0 %v1225_v1  ;;  %1053 = vmatpush3.msk.msra.mxu1 %vm70_vm4, %v1227_v12 }
  0x50   :  { %1028 = vmatpush3.msra.mxu0 %v1417_v47  ;;  %1054 = vmatprep.subr.mxu1 %v1225_v1 }
  0x51   :  { %1029 = vmatprep.subr.mxu0 %v1225_v1  ;;  %1055 = vmatpush3.msk.msra.mxu1 %vm69_vm5, %v1227_v12 }
  0x52   :  { %1030 = vmatpush3.msra.mxu0 %v1431_v52  ;;  %1056 = vmatprep.subr.mxu1 %v1225_v1 }
  0x53   :  { %1031 = vmatprep.subr.mxu0 %v1225_v1  ;;  %1057 = vmatpush3.msk.msra.mxu1 %vm68_vm6, %v1227_v12 }
  0x54   :  { %1032 = vmatpush3.msra.mxu0 %v1467_v61  ;;  %1058 = vmatprep.subr.mxu1 %v1225_v1 }
  0x55   :  { %1033 = vmatprep.subr.mxu0 %v1225_v1  ;;  %1059 = vmatpush3.msk.msra.mxu1 %vm67_vm7, %v1227_v12 }
  0x56   :  { %1034 = vmatpush3.msra.mxu0 %v1482_v13  ;;  %1060 = vmatprep.subr.mxu1 %v1225_v1 }
  0x57   :  { %1035 = vmatprep.subr.mxu0 %v1225_v1  ;;  %1061 = vmatpush3.msk.msra.mxu1 %vm66_vm8, %v1227_v12 }
  0x58   :  { %1036 = vmatpush3.msra.mxu0 %v1496_v29  ;;  %1062 = vmatprep.subr.mxu1 %v1225_v1 }
  0x59   :  { %1037 = vmatprep.subr.mxu0 %v1225_v1  ;;  %1063 = vmatpush3.msk.msra.mxu1 %vm1862_vm9, %v1227_v12  ;;  %vm1863_vm9 = vmmov 0  }
  0x5a   :  { %1038 = vmatpush3.msra.mxu0 %v1521_v43  ;;  %1064 = vmatprep.subr.mxu1 %v1225_v1 }
  0x5b   :  { %1039 = vmatprep.subr.mxu0 %v1225_v1  ;;  %1065 = vmatpush3.msk.msra.mxu1 %vm64_vm10, %v1227_v12 }
  0x5c   :  { %1040 = vmatpush3.msra.mxu0 %v1539_v57  ;;  %1066 = vmatprep.subr.mxu1 %v1225_v1 }
  0x5d   :  { %1041 = vmatprep.subr.mxu0 %v1225_v1  ;;  %1067 = vmatpush3.msk.msra.mxu1 %vm63_vm11, %v1227_v12 }
  0x5e   :  { %1042 = vmatpush3.msra.mxu0 %v1554_v0  ;;  %1043 = vmatprep.mubr.msk.f32.mxu0 %vm1863_vm9, %v1225_v1 }
  0x5f   :  { %1068 = vmatprep.subr.mxu1 %v1225_v1  ;;  %1044 = vmatmul.mubr.f32.vlgmr.msra.gmra.mxu0 %v1551_v60 }
  0x60   :  { %1069 = vmatpush3.msk.msra.mxu1 %vm62_vm12, %v1227_v12  ;;  %1081 = vmatprep.subr.mxu0 %v1225_v1 }
  0x61   :  { %1070 = vmatprep.subr.mxu1 %v1225_v1  ;;  %1082 = vmatpush3.msra.mxu0 %v200_v28 }
  0x62   :  { %1071 = vmatpush3.msk.msra.mxu1 %vm61_vm13, %v1227_v12  ;;  %1083 = vmatprep.subr.mxu0 %v1225_v1 }
  0x63   :  { %1072 = vmatprep.subr.mxu1 %v1225_v1  ;;  %1084 = vmatpush3.msra.mxu0 %v207_v24 }
  0x64   :  { %1073 = vmatpush3.msk.msra.mxu1 %vm60_vm14, %v1227_v12  ;;  %1085 = vmatprep.subr.mxu0 %v1225_v1 }
  0x65   :  { %1074 = vmatprep.subr.mxu1 %v1225_v1  ;;  %1086 = vmatpush3.msra.mxu0 %v214_v27 }
  0x66   :  { %1075 = vmatpush3.msk.msra.mxu1 %vm59_vm15, %v1227_v12  ;;  %1087 = vmatprep.subr.mxu0 %v1225_v1 }
  0x67   :  { %1076 = vmatprep.subr.mxu1 %v1225_v1  ;;  %1088 = vmatpush3.msra.mxu0 %v221_v31 }
  0x68   :  { %1077 = vmatpush3.msk.msra.mxu1 %vm58_vm0, %v1227_v12  ;;  %1078 = vmatprep.mubr.msk.f32.mxu1 %vm1863_vm9, %v1225_v1 }
  0x69   :  { %1089 = vmatprep.subr.mxu0 %v1225_v1  ;;  %1079 = vmatmul.mubr.f32.vlgmr.msra.gmra.mxu1 %v189_v23 }
  0x6a   :  { %1090 = vmatpush3.msra.mxu0 %v228_v34  ;;  %1116 = vmatprep.subr.mxu1 %v1225_v1 }
  0x6b   :  { %1091 = vmatprep.subr.mxu0 %v1225_v1  ;;  %1117 = vmatpush3.msk.msra.mxu1 %vm73_vm1, %v1227_v12  ;;  %vm1864_vm1 = vcmp.le.s32.totalorder %v1374_v33, %v1254_v3 }
  0x6c   :  { %1092 = vmatpush3.msra.mxu0 %v235_v40  ;;  %1118 = vmatprep.subr.mxu1 %v1225_v1 }
  0x6d   :  { %1093 = vmatprep.subr.mxu0 %v1225_v1  ;;  %1119 = vmatpush3.msk.msra.mxu1 %vm72_vm2, %v1227_v12 }
  0x6e   :  { %1094 = vmatpush3.msra.mxu0 %v242_v49  ;;  %1120 = vmatprep.subr.mxu1 %v1225_v1 }
  0x6f   :  { %1095 = vmatprep.subr.mxu0 %v1225_v1  ;;  %1121 = vmatpush3.msk.msra.mxu1 %vm71_vm3, %v1227_v12 }
  0x70   :  { %1096 = vmatpush3.msra.mxu0 %v249_v55  ;;  %1122 = vmatprep.subr.mxu1 %v1225_v1 }
  0x71   :  { %1097 = vmatprep.subr.mxu0 %v1225_v1  ;;  %1123 = vmatpush3.msk.msra.mxu1 %vm70_vm4, %v1227_v12 }
  0x72   :  { %1098 = vmatpush3.msra.mxu0 %v256_v63  ;;  %1124 = vmatprep.subr.mxu1 %v1225_v1 }
  0x73   :  { %1099 = vmatprep.subr.mxu0 %v1225_v1  ;;  %1125 = vmatpush3.msk.msra.mxu1 %vm69_vm5, %v1227_v12 }
  0x74   :  { %1100 = vmatpush3.msra.mxu0 %v263_v15  ;;  %1126 = vmatprep.subr.mxu1 %v1225_v1 }
  0x75   :  { %1101 = vmatprep.subr.mxu0 %v1225_v1  ;;  %1127 = vmatpush3.msk.msra.mxu1 %vm68_vm6, %v1227_v12 }
  0x76   :  { %1102 = vmatpush3.msra.mxu0 %v270_v35  ;;  %1128 = vmatprep.subr.mxu1 %v1225_v1 }
  0x77   :  { %1103 = vmatprep.subr.mxu0 %v1225_v1  ;;  %1129 = vmatpush3.msk.msra.mxu1 %vm67_vm7, %v1227_v12 }
  0x78   :  { %1104 = vmatpush3.msra.mxu0 %v277_v45  ;;  %1130 = vmatprep.subr.mxu1 %v1225_v1 }
  0x79   :  { %1105 = vmatprep.subr.mxu0 %v1225_v1  ;;  %1131 = vmatpush3.msk.msra.mxu1 %vm66_vm8, %v1227_v12 }
  0x7a   :  { %1106 = vmatpush3.msra.mxu0 %v284_v59  ;;  %1132 = vmatprep.subr.mxu1 %v1225_v1 }
  0x7b   :  { %1107 = vmatprep.subr.mxu0 %v1225_v1  ;;  %1133 = vmatpush3.msk.msra.mxu1 %vm1864_vm1, %v1227_v12 }
  0x7c   :  { %1108 = vmatpush3.msra.mxu0 %v291_v21  ;;  %1134 = vmatprep.subr.mxu1 %v1225_v1 }
  0x7d   :  { %1109 = vmatprep.subr.mxu0 %v1225_v1  ;;  %1135 = vmatpush3.msk.msra.mxu1 %vm64_vm10, %v1227_v12 }
  0x7e   :  { %1110 = vmatpush3.msra.mxu0 %v298_v32  ;;  %1136 = vmatprep.subr.mxu1 %v1225_v1 }
  0x7f   :  { %1111 = vmatprep.subr.mxu0 %v1225_v1  ;;  %1137 = vmatpush3.msk.msra.mxu1 %vm63_vm11, %v1227_v12 }
  0x80   :  { %1112 = vmatpush3.msra.mxu0 %v305_v44  ;;  %1113 = vmatprep.mubr.msk.f32.mxu0 %vm1863_vm9, %v1225_v1 }
  0x81   :  { %1138 = vmatprep.subr.mxu1 %v1225_v1  ;;  %1114 = vmatmul.mubr.f32.vlgmr.msra.gmra.mxu0 %v1536_v51 }
  0x82   :  { %1139 = vmatpush3.msk.msra.mxu1 %vm62_vm12, %v1227_v12  ;;  %1148 = vmatprep.mubr.msk.f32.mxu1 %vm1863_vm9, %v1225_v1 }
  0x83   :  { %1140 = vmatprep.subr.mxu1 %v1225_v1 }
  0x84   :  { %1141 = vmatpush3.msk.msra.mxu1 %vm61_vm13, %v1227_v12 }
  0x85   :  { %1142 = vmatprep.subr.mxu1 %v1225_v1 }
  0x86   :  { %1143 = vmatpush3.msk.msra.mxu1 %vm60_vm14, %v1227_v12 }
  0x87   :  { %1144 = vmatprep.subr.mxu1 %v1225_v1 }
  0x88   :  { %1145 = vmatpush3.msk.msra.mxu1 %vm59_vm15, %v1227_v12 }
  0x89   :  { %1146 = vmatprep.subr.mxu1 %v1225_v1 }
  0x8a   :  { %1147 = vmatpush3.msk.msra.mxu1 %vm58_vm0, %v1227_v12 }
  0x8b   :  { %1149 = vmatmul.mubr.f32.vlgmr.msra.gmra.mxu1 %v1536_v51 }
  0xfe   :  { %v193_v4 = vpop.f32.mrf.mxu0 }
 0x100   :  { %v975_v5 = vpop.f32.mrf.mxu0 }
 0x108   :  { %v344_v6 = vpop.f32.mrf.mxu1 }
 0x109   :  { %v345_v18 = vadd.f32 %v344_v6, %v193_v4 }
 0x10a   :  { %v1010_v7 = vpop.f32.mrf.mxu1 }
 0x11f   :  { %v448_v8 = vpop.f32.mrf.mxu0 }
 0x120   :  { %v449_v20 = vadd.f32 %v448_v8, %v345_v18 }
 0x121   :  { %v1045_v9 = vpop.f32.mrf.mxu0 }
 0x129   :  { %v537_v10 = vpop.f32.mrf.mxu1 }
 0x12a   :  { %v538_v1 = vadd.f32 %v537_v10, %v449_v20 }
 0x12b   :  { %v1080_v11 = vpop.f32.mrf.mxu1 }
 0x141   :  { %v656_v16 = vpop.f32.mrf.mxu0 }
 0x142   :  { %v657_v22 = vadd.f32 %v656_v16, %v538_v1 }
 0x143   :  { %v1115_v17 = vpop.f32.mrf.mxu0 }
 0x14b   :  { %v743_v24 = vpop.f32.mrf.mxu1 }
 0x14c   :  { %v744_v25 = vadd.f32 %v743_v24, %v657_v22 }
 0x14d   :  { %v1150_v2 = vpop.f32.mrf.mxu1 }
 0x14e   :  { %v747_v3 = vmul.f32 %v744_v25, %v744_v25 }
 0x150   :  { %748 = vadd.xlane.f32.xlu0 %v747_v3 }
 0x1d9   :  { %v749_v12 = vpop.xlane.xlu0 %748 }
 0x1da   :  { %v751_v27 = vmul.f32 0.0078125, %v749_v12 }
 0x1dc   :  { %v752_v28 = vrot.slane %v751_v27, 4 }
 0x1de   :  { %v753_v31 = vadd.f32 %v752_v28, %v751_v27 }
 0x1e0   :  { %v754_v33 = vrot.slane %v753_v31, 2 }
 0x1e2   :  { %v755_v34 = vadd.f32 %v754_v33, %v753_v31 }
 0x1e4   :  { %v756_v36 = vrot.slane %v755_v34, 1 }
 0x1e6   :  { %v757_v37 = vadd.f32 %v756_v36, %v755_v34 }
 0x1e8   :  { %758 = vst [vmem:[#allocation7] sm:$0xff] %v757_v37 }
 0x1e9   :  { %1208 = shalt.err (!%p1205_p0)
}
 0x1ea   :  { %768 = dma.vmem_to_hbm [thread:$0]  %s766_s1, 128, %s1859_s2, [#allocation4]  }
 0x1eb   :  { %1221 = dma.done.wait [#allocation4], 128  }
 0x1ec   :  { %1222 = vsyncadd [#allocation4], 4294967168 }
 0x1ed   :  { %772 = vsyncpa [#allocation3], 1 }
 0x1ee   :  { %773 = vsyncpa [#allocation6], 1 }
 0x1ef   :  { %774 = vsyncpa [#allocation4], 1 }

</bundles_post_ra>
